<compile_context>
chip_gen: v6e
topology: v6e:2x2x1
jax: 0.10.0
libtpu: 0.0.40
codegen_flags: <defaults>
</compile_context>

<pallas_src>
import math

import jax
import jax.numpy as jnp
import numpy as np
from jax.experimental import pallas as pl
from jax.experimental.pallas import tpu as pltpu


# --------------------------- init-time table build ---------------------------
def make_pe_table(d_model, max_len=512, dtype=jnp.float32):
    """Matches torch __init__: host-side constant table, shape (1, max_len, d).

    dtype=jnp.bfloat16 halves HBM traffic of the copy if the consumer accepts
    bf16; default stays float32 to match the torch module exactly.
    """
    position = np.arange(0, max_len, dtype=np.float32)[:, None]              # (L, 1)
    div_term = np.exp(np.arange(0, d_model, 2, dtype=np.float32)
                      * -(math.log(10000.0) / d_model))                      # (d/2,)
    pe = np.zeros((max_len, d_model), dtype=np.float32)
    pe[:, 0::2] = np.sin(position * div_term)
    pe[:, 1::2] = np.cos(position * div_term)
    return jnp.asarray(pe[None]).astype(dtype)                               # (1, L, d)


# --------------------------------- kernel ------------------------------------
def _pe_copy_kernel(w_ref, o_ref):
    # forward() is a pure slice: one lane-dense tile copied per grid step.
    o_ref[...] = w_ref[...]


def _round_up(a, m):
    return ((a + m - 1) // m) * m


def _round_down(a, m):
    return (a // m) * m


def positional_embedding_forward(x, pe_table):
    """forward(x) == pe_table[:, :x.shape[1], :]  (only x's seq length is used)."""
    _, max_len, d_model = pe_table.shape
    S = int(x.shape[1])
    assert S <= max_len, "sequence length exceeds max_len of the PE table"

    dtype = pe_table.dtype
    itemsize = jnp.dtype(dtype).itemsize
    sublane = max(8, 32 // itemsize)          # 8 for f32, 16 for bf16, 32 for int8/fp8

    table2d = pe_table.reshape(max_len, d_model)

    # ---- layout: present the contiguous prefix as a lane-dense 2-D slab ----
    flat = S * d_model
    width = next((w for w in (2048, 1024, 512, 256, 128) if flat % w == 0), None)
    if width is not None:
        rows = flat // width
        # pe[:, :S, :] is a contiguous row-major prefix, so this reshape is a
        # pure re-view of the same elements.
        src = table2d[:S].reshape(rows, width)
    else:
        # Fallback for awkward (S, d_model): keep (S, d_model) layout; stores
        # with last dim < 128 are masked but still correct.
        width, rows = d_model, S
        src = table2d[:S]

    # ---- tile rows: sublane-aligned, ~1-2 MiB per step, >=2 steps if possible
    if rows <= sublane:
        ts = rows                              # single block == full array dims
    else:
        bytes_per_row = width * itemsize
        target = max(sublane, (2 * 1024 * 1024) // bytes_per_row)   # ~2 MiB/step
        ts = max(sublane, _round_down(min(target, rows), sublane))
        # keep at least 2 grid steps so v7x's two TensorCores can split the copy
        half = _round_up(pl.cdiv(rows, 2), sublane)
        ts = min(ts, half)
    grid = (pl.cdiv(rows, ts),)

    # Worst-case pipelined VMEM = 2 buffers * (in + out) * tile <= ~8 MiB,
    # comfortably under v7x's 32 MiB default scoped limit; no override needed.
    out2d = pl.pallas_call(
        _pe_copy_kernel,
        out_shape=jax.ShapeDtypeStruct((rows, width), dtype),
        grid=grid,
        in_specs=[pl.BlockSpec((ts, width), lambda i: (i, 0))],
        out_specs=pl.BlockSpec((ts, width), lambda i: (i, 0)),
        compiler_params=pltpu.CompilerParams(
            dimension_semantics=("parallel",)),
        cost_estimate=pl.CostEstimate(
            flops=0,
            transcendentals=0,
            bytes_accessed=2 * S * d_model * itemsize),
    )(src)

    return out2d.reshape(1, S, d_model)


# ---------------------------------- demo -------------------------------------
if __name__ == "__main__":
    # Small shapes consistent with the module: batch=2, seq=8, d_model=32.
    B, S, d_model, max_len = 2, 8, 32, 512

    key = jax.random.PRNGKey(0)
    x = jax.random.normal(key, (B, S, d_model), jnp.float32)  # values unused by forward

    pe_table = make_pe_table(d_model, max_len)                # nn.Parameter analogue

    out = positional_embedding_forward(x, pe_table)
    out = jax.block_until_ready(out)

    # Reference: rebuild the torch table in NumPy and slice it.
    position = np.arange(0, max_len, dtype=np.float32)[:, None]
    div_term = np.exp(np.arange(0, d_model, 2, dtype=np.float32)
                      * -(math.log(10000.0) / d_model))
    ref = np.zeros((max_len, d_model), dtype=np.float32)
    ref[:, 0::2] = np.sin(position * div_term)
    ref[:, 1::2] = np.cos(position * div_term)
    ref = ref[None, :S, :]

    assert out.shape == (1, S, d_model), f"bad shape {out.shape}"
    assert np.allclose(np.asarray(out), ref, atol=1e-6, rtol=1e-6), "mismatch vs reference"

    # Extra check: an odd sequence length that is not a multiple of 8.
    S2 = 13
    x2 = jax.random.normal(key, (B, S2, d_model), jnp.float32)
    out2 = jax.block_until_ready(positional_embedding_forward(x2, pe_table))
    assert out2.shape == (1, S2, d_model)
    assert np.allclose(np.asarray(out2), ref[:, :0, :].repeat(0, axis=1) if False else
                       np.asarray(make_pe_table(d_model, max_len))[:, :S2, :],
                       atol=1e-6, rtol=1e-6), "mismatch vs reference (S=13)"

    print("KERNEL_OK")
</pallas_src>

<mosaic_0001>
module attributes {stable_mosaic.version = 11 : i64} {
  func.func @_pe_copy_kernel(%arg0: i32, %arg1: memref<1x256xf32, #tpu.memory_space<vmem>>, %arg2: memref<1x256xf32, #tpu.memory_space<vmem>>) attributes {dimension_semantics = [#tpu.dimension_semantics<parallel>], iteration_bounds = array<i64: 1>, scalar_prefetch = 0 : i64, scratch_operands = 0 : i64, tpu.core_type = #tpu.core_type<tc>, window_params = [{transform_indices = @transform_0, window_bounds = array<i64: 1, 256>}, {transform_indices = @transform_1, window_bounds = array<i64: 1, 256>}]} {
    %c0 = arith.constant 0 : index
    %c0_0 = arith.constant 0 : index
    %0 = vector.load %arg1[%c0, %c0_0] : memref<1x256xf32, #tpu.memory_space<vmem>>, vector<1x256xf32>
    %c0_1 = arith.constant 0 : index
    %c0_2 = arith.constant 0 : index
    %1 = vector.load %arg2[%c0_1, %c0_2] : memref<1x256xf32, #tpu.memory_space<vmem>>, vector<1x256xf32>
    tpu.vector_store %arg2[%c0_1, %c0_2], %0 {strides = array<i32>} : memref<1x256xf32, #tpu.memory_space<vmem>>, vector<1x256xf32>,
    return
  }
  func.func @transform_0(%arg0: i32) -> (i32, i32) {
    %c0_i32 = arith.constant 0 : i32
    %c0_i32_0 = arith.constant 0 : i32
    return %arg0, %c0_i32 : i32, i32
  }
  func.func @transform_1(%arg0: i32) -> (i32, i32) {
    %c0_i32 = arith.constant 0 : i32
    %c0_i32_0 = arith.constant 0 : i32
    return %arg0, %c0_i32 : i32, i32
  }
}

</mosaic_0001>

<bundles_post_ra>
// kernel: tpu_custom_call.1
= control target key start
LH: loop header
LB: loop body
LE: loop exit
PB: predicated region body
PF: predicated region fallthrough
CT: control target
= control target key end

     0   :  { %6 = vsyncpa [#allocation3], 0  ;;  %s106_s0 = inlined_call_operand.hbm [shape: f32[1,256], index: 0, kind: input, shape index: {}]   ;;  %s107_s1 = inlined_call_operand.hbm [shape: f32[1,256], index: 1, kind: output, shape index: {}]  }
   0x1   :  { %7 = vsyncpa [#allocation4], 0  ;;  %s88_s6 = smov [#allocation2]  }
   0x2   :  { %s14_s7 = sshll.u32 %s88_s6, 4  ;;  %s15_s7 = int_to_ptr.vmem [resolvable:$true] %s14_s7 }
   0x3   :  { %s52_s8 = scalar_lea.vmem %s15_s7, 32  ;;  %p57_p1 = scmp.lt.s32.totalorder %s15_s7, %s15_s7 }
   0x4   :  { %p53_p0 = scmp.ne.s32.totalorder %s15_s7, %s52_s8  ;;  %p58_p2 = scmp.lt.s32.totalorder %s52_s8, %s52_s8 }
   0x6   :  { %p59_p3 = por %p58_p2, %p57_p1 }
   0x8   :  { %p60_p4 = pnand %p59_p3, %p53_p0 }
   0xa   :  { %63 = shalt.err (!%p60_p4)
}
   0xb   :  { %17 = dma.hbm_to_vmem [thread:$0]  %s106_s0, 32, %s15_s7, [#allocation3]  }
   0xc   :  { %84 = dma.done.wait [#allocation3], 32  }
   0xd   :  { %85 = vsyncadd [#allocation3], 4294967264  ;;  %v22_v0 = vlaneseq  ;;  %s89_s11 = smov [#allocation5]   ;;  %v21_v1 = vld [vmem:[#allocation2] sm:$0x3] }
   0xe   :  { %s33_s12 = sshll.u32 %s89_s11, 4  ;;  %s34_s12 = int_to_ptr.vmem [resolvable:$true] %s33_s12 }
   0xf   :  { %vm24_vm0 = vcmp.lt.s32.totalorder %v22_v0, 256  ;;  %s64_s13 = scalar_lea.vmem %s34_s12, 32  ;;  %p69_p6 = scmp.lt.s32.totalorder %s34_s12, %s34_s12 }
  0x10   :  { %26 = vst.msk [vmem:[#allocation5] sm:$0x3] %vm24_vm0, %v21_v1  ;;  %p65_p5 = scmp.ne.s32.totalorder %s34_s12, %s64_s13  ;;  %p70_p7 = scmp.lt.s32.totalorder %s64_s13, %s64_s13 }
  0x12   :  { %p71_p8 = por %p70_p7, %p69_p6 }
  0x14   :  { %p72_p9 = pnand %p71_p8, %p65_p5 }
  0x16   :  { %75 = shalt.err (!%p72_p9)
}
  0x17   :  { %36 = dma.vmem_to_hbm [thread:$0]  %s34_s12, 32, %s107_s1, [#allocation4]  }
  0x18   :  { %86 = dma.done.wait [#allocation4], 32  }
  0x19   :  { %87 = vsyncadd [#allocation4], 4294967264 }
  0x1a   :  { %40 = vsyncpa [#allocation3], 1 }
  0x1b   :  { %41 = vsyncpa [#allocation4], 1 }

</bundles_post_ra>
